<compile_context>
chip_gen: v6e
topology: v6e:2x2x1
jax: 0.10.0
libtpu: 0.0.40
codegen_flags: <defaults>
</compile_context>

<pallas_src>
import functools

import jax
import jax.numpy as jnp
from jax import lax
from jax.experimental import pallas as pl
from jax.experimental.pallas import tpu as pltpu


def _mlp_lif_seq_kernel(z_ref, w_ref, vdecay_ref, vstate_in_ref,
                        v_seq_ref, vstate_out_ref, *,
                        t_chunk, bb, t_valid, has_tail):
    """One grid step = t_chunk LIF timesteps for one batch block.

    z_ref         : (t_chunk, bb, L)   input chunk (compute dtype, e.g. bf16)
    w_ref         : (L, O)             resident weights (compute dtype)
    vdecay_ref    : (1, O)             resident decay (f32)
    vstate_in_ref : (bb, O)            caller's initial state (read at chunk 0)
    v_seq_ref     : (t_chunk, bb, O)   per-timestep membrane potentials (output)
    vstate_out_ref: (bb, O)            resident carried LIF state (aliased)
    """
    c = pl.program_id(1)

    # Load the caller-provided state into the resident state block once per
    # batch block (c == 0).  Chunks c > 0 continue from the carried value.
    @pl.when(c == 0)
    def _():
        vstate_out_ref[...] = vstate_in_ref[...]

    l = w_ref.shape[0]
    o = w_ref.shape[1]

    # Synapse currents for every timestep of the chunk in a single MXU matmul
    # (time folded into the M dimension; f32 accumulate).  Kept in registers —
    # no VMEM round trip through the output ref.
    z_chunk = z_ref[...].reshape(t_chunk * bb, l)
    i_chunk = jnp.dot(z_chunk, w_ref[...], preferred_element_type=jnp.float32)
    i_3d = i_chunk.reshape(t_chunk, bb, o)

    # Hoisted broadcast (JAX does not CSE broadcast_in_dim inside the loop).
    decay = jnp.broadcast_to(vdecay_ref[...], (bb, o))

    v = vstate_out_ref[...]
    v_steps = []
    for t in range(t_chunk):                      # static unrolled recurrence
        v_new = v * decay + i_3d[t]               # LIF: v = v*decay + i (VPU only)
        if has_tail:
            # Padded timesteps (beyond the real T) must not decay the state.
            valid = (c * t_chunk + t) < t_valid
            v_new = jnp.where(valid, v_new, v)
        v = v_new
        v_steps.append(v)

    # ONE full-block store for the whole chunk's trajectory.
    v_seq_ref[...] = jnp.stack(v_steps, axis=0).astype(v_seq_ref.dtype)
    vstate_out_ref[...] = v


def _pick_t_chunk(T, bb, L, O, z_itemsize, unroll_cap, vmem_budget_bytes):
    """Largest chunk that fits the VMEM budget and the unroll cap."""
    # Double-buffered z block + double-buffered v_seq block per timestep.
    per_t = bb * (L * z_itemsize + O * 4) * 2
    t_budget = max(1, int(vmem_budget_bytes // max(per_t, 1)))
    return max(1, min(T, unroll_cap, t_budget))


def non_spiking_mlp_forward_seq(z_seq, w_t, v_decay, state_v=None, *,
                                compute_dtype=jnp.bfloat16,
                                out_dtype=jnp.float32,
                                max_unrolled_steps=64,
                                batch_block=128,
                                vmem_budget_bytes=8 * 1024 * 1024):
    """Run T timesteps of non_SpikingMLP in a single fused pallas_call.

    z_seq   : [T, B, L]   inputs for T consecutive calls of the module
    w_t     : [L, O]      linear weight, pre-transposed from PyTorch's [O, L]
    v_decay : [O]         learnable decay
    state_v : [B, O] or None (None -> zeros, matching the module's first call)

    Returns (v_seq [T, B, O], final_state [B, O] f32).
    """
    T, B, L = z_seq.shape
    O = w_t.shape[1]

    # Batch blocking: bb is a multiple of 8 (sublane tile); the leading grid
    # axis over batch blocks is "parallel" (2 TensorCores on v7x).
    bb = min(batch_block, max(8, ((B + 7) // 8) * 8))
    bb = ((bb + 7) // 8) * 8
    b_pad = ((B + bb - 1) // bb) * bb
    n_bblocks = b_pad // bb

    cdt = jnp.dtype(compute_dtype) if compute_dtype is not None else z_seq.dtype
    t_chunk = _pick_t_chunk(T, bb, L, O, jnp.dtype(cdt).itemsize,
                            max_unrolled_steps, vmem_budget_bytes)
    n_chunks = pl.cdiv(T, t_chunk)
    T_pad = n_chunks * t_chunk
    has_tail = (T_pad != T)

    if state_v is None:
        state_v = jnp.zeros((B, O), jnp.float32)
    state_pad = jnp.zeros((b_pad, O), jnp.float32).at[:B].set(
        state_v.astype(jnp.float32))

    # Operands for the matmul in compute dtype (bf16 halves the z DMA stream);
    # recurrence stays f32.
    z_pad = jnp.zeros((T_pad, b_pad, L), cdt).at[:T, :B, :].set(z_seq.astype(cdt))
    w_c = w_t.astype(cdt)
    vdecay_2d = v_decay.reshape(1, O).astype(jnp.float32)

    kernel = functools.partial(_mlp_lif_seq_kernel, t_chunk=t_chunk, bb=bb,
                               t_valid=T, has_tail=has_tail)

    v_seq_pad, state_out = pl.pallas_call(
        kernel,
        out_shape=(
            jax.ShapeDtypeStruct((T_pad, b_pad, O), out_dtype),
            jax.ShapeDtypeStruct((b_pad, O), jnp.float32),
        ),
        grid=(n_bblocks, n_chunks),
        in_specs=[
            pl.BlockSpec((t_chunk, bb, L), lambda b, c: (c, b, 0)),  # z chunk (pipelined)
            pl.BlockSpec((L, O), lambda b, c: (0, 0)),               # W resident
            pl.BlockSpec((1, O), lambda b, c: (0, 0)),               # v_decay resident
            pl.BlockSpec((bb, O), lambda b, c: (b, 0)),              # initial state
        ],
        out_specs=(
            pl.BlockSpec((t_chunk, bb, O), lambda b, c: (c, b, 0)),  # per-step v
            pl.BlockSpec((bb, O), lambda b, c: (b, 0)),              # carried state
        ),
        input_output_aliases={3: 1},                                 # state in place
        compiler_params=pltpu.CompilerParams(
            dimension_semantics=("parallel", "arbitrary"),
            vmem_limit_bytes=32 * 1024 * 1024),
    )(z_pad, w_c, vdecay_2d, state_pad)

    v_seq = v_seq_pad[:T, :B, :]
    return v_seq, state_out[:B]


def non_spiking_mlp_forward(z, w_t, v_decay, state_v=None, **kwargs):
    """Single-timestep API matching the PyTorch module's forward(z)."""
    v_seq, new_state = non_spiking_mlp_forward_seq(z[None, ...], w_t, v_decay,
                                                   state_v, **kwargs)
    return v_seq[0], new_state


if __name__ == "__main__":
    # Shapes consistent with the module: l_1_size=32, output_size=8, batch=2, T=16.
    T, B, L, O = 16, 2, 32, 8

    key = jax.random.PRNGKey(0)
    k_w, k_decay, k_z = jax.random.split(key, 3)

    # nn.Linear default init U(-1/sqrt(L), 1/sqrt(L)); weight shape [O, L].
    bound = 1.0 / jnp.sqrt(jnp.float32(L))
    w = jax.random.uniform(k_w, (O, L), jnp.float32, minval=-bound, maxval=bound)
    # LIF v_decay ~ U(0.8, 0.85).
    v_decay = jax.random.uniform(k_decay, (O,), jnp.float32, minval=0.8, maxval=0.85)
    z_seq = jax.random.normal(k_z, (T, B, L), jnp.float32)
    w_t = w.T  # [L, O]

    # Reference: plain JAX per-step LIF recurrence (f32).
    def ref_run(zs, v0):
        i_seq = jnp.einsum("tbl,ol->tbo", zs, w, preferred_element_type=jnp.float32)

        def step(v, i_t):
            v = v * v_decay[None, :] + i_t
            return v, v

        v_last, v_all = lax.scan(step, v0, i_seq)
        return v_all, v_last

    v_ref1, s_ref1 = ref_run(z_seq, jnp.zeros((B, O), jnp.float32))
    v_ref2, s_ref2 = ref_run(z_seq, s_ref1)

    # --- f32 compute path: exact parity with the reference -------------------
    fwd_f32 = jax.jit(functools.partial(non_spiking_mlp_forward_seq,
                                        compute_dtype=jnp.float32))
    v1, s1 = fwd_f32(z_seq, w_t, v_decay, None)
    v2, s2 = fwd_f32(z_seq, w_t, v_decay, s1)
    jax.block_until_ready((v1, v2, s2))
    tol = dict(atol=5e-5, rtol=5e-5)
    assert jnp.allclose(v1, v_ref1, **tol), "f32 segment-1 outputs mismatch"
    assert jnp.allclose(s1, s_ref1, **tol), "f32 segment-1 state mismatch"
    assert jnp.allclose(v2, v_ref2, **tol), "f32 segment-2 outputs mismatch"
    assert jnp.allclose(s2, s_ref2, **tol), "f32 segment-2 state mismatch"

    # --- bf16 operand path (default): MXU-native, half the z/W DMA -----------
    fwd_bf16 = jax.jit(non_spiking_mlp_forward_seq)
    v1b, s1b = fwd_bf16(z_seq, w_t, v_decay, None)
    v2b, s2b = fwd_bf16(z_seq, w_t, v_decay, s1b)
    jax.block_until_ready((v1b, v2b, s2b))
    tol_b = dict(atol=3e-2, rtol=3e-2)
    assert jnp.allclose(v1b, v_ref1, **tol_b), "bf16 segment-1 outputs mismatch"
    assert jnp.allclose(s2b, s_ref2, **tol_b), "bf16 segment-2 state mismatch"

    # --- non-divisible T (tail masking) path ----------------------------------
    T_odd = 13
    v_ref_odd, s_ref_odd = ref_run(z_seq[:T_odd], jnp.zeros((B, O), jnp.float32))
    fwd_tail = jax.jit(functools.partial(non_spiking_mlp_forward_seq,
                                         compute_dtype=jnp.float32,
                                         max_unrolled_steps=8))
    v_odd, s_odd = fwd_tail(z_seq[:T_odd], w_t, v_decay, None)
    jax.block_until_ready((v_odd, s_odd))
    assert jnp.allclose(v_odd, v_ref_odd, **tol), "tail-masked outputs mismatch"
    assert jnp.allclose(s_odd, s_ref_odd, **tol), "tail-masked state mismatch"

    # --- single-step API parity with the PyTorch module's per-call forward ----
    v_single, _ = non_spiking_mlp_forward(z_seq[0], w_t, v_decay, None,
                                          compute_dtype=jnp.float32)
    assert jnp.allclose(v_single, v_ref1[0], **tol), "single-step mismatch"

    print("KERNEL_OK")
</pallas_src>

<mosaic_0001>
module attributes {stable_mosaic.version = 11 : i64} {
  func.func @_mlp_lif_seq_kernel(%arg0: i32, %arg1: i32, %arg2: memref<16x8x32xf32, #tpu.memory_space<vmem>>, %arg3: memref<32x8xf32, #tpu.memory_space<vmem>>, %arg4: memref<1x8xf32, #tpu.memory_space<vmem>>, %arg5: memref<8x8xf32, #tpu.memory_space<vmem>>, %arg6: memref<16x8x8xf32, #tpu.memory_space<vmem>>, %arg7: memref<8x8xf32, #tpu.memory_space<vmem>>) attributes {dimension_semantics = [#tpu.dimension_semantics<parallel>, #tpu.dimension_semantics<arbitrary>], iteration_bounds = array<i64: 1, 1>, scalar_prefetch = 0 : i64, scratch_operands = 0 : i64, tpu.core_type = #tpu.core_type<tc>, window_params = [{transform_indices = @transform_0, window_bounds = array<i64: 16, 8, 32>}, {pipeline_mode = #tpu.pipeline_mode<synchronous>, transform_indices = @transform_1, window_bounds = array<i64: 32, 8>}, {pipeline_mode = #tpu.pipeline_mode<synchronous>, transform_indices = @transform_2, window_bounds = array<i64: 1, 8>}, {transform_indices = @transform_3, window_bounds = array<i64: 8, 8>}, {transform_indices = @transform_4, window_bounds = array<i64: 16, 8, 8>}, {transform_indices = @transform_5, window_bounds = array<i64: 8, 8>}]} {
    %c0_i32 = arith.constant 0 : i32
    %0 = arith.cmpi eq, %arg1, %c0_i32 : i32
    %1 = arith.extui %0 : i1 to i32
    %c0_i32_0 = arith.constant 0 : i32
    %2 = arith.cmpi ne, %1, %c0_i32_0 : i32
    scf.if %2 {
      %c0_14 = arith.constant 0 : index
      %c0_15 = arith.constant 0 : index
      %95 = vector.load %arg5[%c0_14, %c0_15] : memref<8x8xf32, #tpu.memory_space<vmem>>, vector<8x8xf32>
      %c0_16 = arith.constant 0 : index
      %c0_17 = arith.constant 0 : index
      %96 = vector.load %arg7[%c0_16, %c0_17] : memref<8x8xf32, #tpu.memory_space<vmem>>, vector<8x8xf32>
      tpu.vector_store %arg7[%c0_16, %c0_17], %95 {strides = array<i32>} : memref<8x8xf32, #tpu.memory_space<vmem>>, vector<8x8xf32>,
    } else {
    }
    %c0 = arith.constant 0 : index
    %c0_1 = arith.constant 0 : index
    %c0_2 = arith.constant 0 : index
    %3 = vector.load %arg2[%c0, %c0_1, %c0_2] : memref<16x8x32xf32, #tpu.memory_space<vmem>>, vector<16x8x32xf32>
    %4 = vector.shape_cast %3 : vector<16x8x32xf32> to vector<128x32xf32>
    %c0_3 = arith.constant 0 : index
    %c0_4 = arith.constant 0 : index
    %5 = vector.load %arg3[%c0_3, %c0_4] : memref<32x8xf32, #tpu.memory_space<vmem>>, vector<32x8xf32>
    %cst = arith.constant dense<0.000000e+00> : vector<128x8xf32>
    %6 = tpu.matmul %4, %5, %cst {dimension_numbers = #tpu.dot_dimension_numbers<[1], [0], [0], [1], [0, 0, 1, 1], [], []>} : vector<128x32xf32>, vector<32x8xf32>, vector<128x8xf32> -> vector<128x8xf32>
    %7 = vector.shape_cast %6 : vector<128x8xf32> to vector<16x8x8xf32>
    %c0_5 = arith.constant 0 : index
    %c0_6 = arith.constant 0 : index
    %8 = vector.load %arg4[%c0_5, %c0_6] : memref<1x8xf32, #tpu.memory_space<vmem>>, vector<1x8xf32>
    %9 = vector.shape_cast %8 : vector<1x8xf32> to vector<1x8xf32>
    %10 = vector.broadcast %9 : vector<1x8xf32> to vector<8x8xf32>
    %c0_7 = arith.constant 0 : index
    %c0_8 = arith.constant 0 : index
    %11 = vector.load %arg7[%c0_7, %c0_8] : memref<8x8xf32, #tpu.memory_space<vmem>>, vector<8x8xf32>
    %12 = arith.mulf %11, %10 : vector<8x8xf32>
    %13 = vector.extract_strided_slice %7 {offsets = [0, 0, 0], sizes = [1, 8, 8], strides = [1, 1, 1]} : vector<16x8x8xf32> to vector<1x8x8xf32>
    %14 = vector.shape_cast %13 : vector<1x8x8xf32> to vector<8x8xf32>
    %15 = arith.addf %12, %14 : vector<8x8xf32>
    %16 = arith.mulf %15, %10 : vector<8x8xf32>
    %17 = vector.extract_strided_slice %7 {offsets = [1, 0, 0], sizes = [1, 8, 8], strides = [1, 1, 1]} : vector<16x8x8xf32> to vector<1x8x8xf32>
    %18 = vector.shape_cast %17 : vector<1x8x8xf32> to vector<8x8xf32>
    %19 = arith.addf %16, %18 : vector<8x8xf32>
    %20 = arith.mulf %19, %10 : vector<8x8xf32>
    %21 = vector.extract_strided_slice %7 {offsets = [2, 0, 0], sizes = [1, 8, 8], strides = [1, 1, 1]} : vector<16x8x8xf32> to vector<1x8x8xf32>
    %22 = vector.shape_cast %21 : vector<1x8x8xf32> to vector<8x8xf32>
    %23 = arith.addf %20, %22 : vector<8x8xf32>
    %24 = arith.mulf %23, %10 : vector<8x8xf32>
    %25 = vector.extract_strided_slice %7 {offsets = [3, 0, 0], sizes = [1, 8, 8], strides = [1, 1, 1]} : vector<16x8x8xf32> to vector<1x8x8xf32>
    %26 = vector.shape_cast %25 : vector<1x8x8xf32> to vector<8x8xf32>
    %27 = arith.addf %24, %26 : vector<8x8xf32>
    %28 = arith.mulf %27, %10 : vector<8x8xf32>
    %29 = vector.extract_strided_slice %7 {offsets = [4, 0, 0], sizes = [1, 8, 8], strides = [1, 1, 1]} : vector<16x8x8xf32> to vector<1x8x8xf32>
    %30 = vector.shape_cast %29 : vector<1x8x8xf32> to vector<8x8xf32>
    %31 = arith.addf %28, %30 : vector<8x8xf32>
    %32 = arith.mulf %31, %10 : vector<8x8xf32>
    %33 = vector.extract_strided_slice %7 {offsets = [5, 0, 0], sizes = [1, 8, 8], strides = [1, 1, 1]} : vector<16x8x8xf32> to vector<1x8x8xf32>
    %34 = vector.shape_cast %33 : vector<1x8x8xf32> to vector<8x8xf32>
    %35 = arith.addf %32, %34 : vector<8x8xf32>
    %36 = arith.mulf %35, %10 : vector<8x8xf32>
    %37 = vector.extract_strided_slice %7 {offsets = [6, 0, 0], sizes = [1, 8, 8], strides = [1, 1, 1]} : vector<16x8x8xf32> to vector<1x8x8xf32>
    %38 = vector.shape_cast %37 : vector<1x8x8xf32> to vector<8x8xf32>
    %39 = arith.addf %36, %38 : vector<8x8xf32>
    %40 = arith.mulf %39, %10 : vector<8x8xf32>
    %41 = vector.extract_strided_slice %7 {offsets = [7, 0, 0], sizes = [1, 8, 8], strides = [1, 1, 1]} : vector<16x8x8xf32> to vector<1x8x8xf32>
    %42 = vector.shape_cast %41 : vector<1x8x8xf32> to vector<8x8xf32>
    %43 = arith.addf %40, %42 : vector<8x8xf32>
    %44 = arith.mulf %43, %10 : vector<8x8xf32>
    %45 = vector.extract_strided_slice %7 {offsets = [8, 0, 0], sizes = [1, 8, 8], strides = [1, 1, 1]} : vector<16x8x8xf32> to vector<1x8x8xf32>
    %46 = vector.shape_cast %45 : vector<1x8x8xf32> to vector<8x8xf32>
    %47 = arith.addf %44, %46 : vector<8x8xf32>
    %48 = arith.mulf %47, %10 : vector<8x8xf32>
    %49 = vector.extract_strided_slice %7 {offsets = [9, 0, 0], sizes = [1, 8, 8], strides = [1, 1, 1]} : vector<16x8x8xf32> to vector<1x8x8xf32>
    %50 = vector.shape_cast %49 : vector<1x8x8xf32> to vector<8x8xf32>
    %51 = arith.addf %48, %50 : vector<8x8xf32>
    %52 = arith.mulf %51, %10 : vector<8x8xf32>
    %53 = vector.extract_strided_slice %7 {offsets = [10, 0, 0], sizes = [1, 8, 8], strides = [1, 1, 1]} : vector<16x8x8xf32> to vector<1x8x8xf32>
    %54 = vector.shape_cast %53 : vector<1x8x8xf32> to vector<8x8xf32>
    %55 = arith.addf %52, %54 : vector<8x8xf32>
    %56 = arith.mulf %55, %10 : vector<8x8xf32>
    %57 = vector.extract_strided_slice %7 {offsets = [11, 0, 0], sizes = [1, 8, 8], strides = [1, 1, 1]} : vector<16x8x8xf32> to vector<1x8x8xf32>
    %58 = vector.shape_cast %57 : vector<1x8x8xf32> to vector<8x8xf32>
    %59 = arith.addf %56, %58 : vector<8x8xf32>
    %60 = arith.mulf %59, %10 : vector<8x8xf32>
    %61 = vector.extract_strided_slice %7 {offsets = [12, 0, 0], sizes = [1, 8, 8], strides = [1, 1, 1]} : vector<16x8x8xf32> to vector<1x8x8xf32>
    %62 = vector.shape_cast %61 : vector<1x8x8xf32> to vector<8x8xf32>
    %63 = arith.addf %60, %62 : vector<8x8xf32>
    %64 = arith.mulf %63, %10 : vector<8x8xf32>
    %65 = vector.extract_strided_slice %7 {offsets = [13, 0, 0], sizes = [1, 8, 8], strides = [1, 1, 1]} : vector<16x8x8xf32> to vector<1x8x8xf32>
    %66 = vector.shape_cast %65 : vector<1x8x8xf32> to vector<8x8xf32>
    %67 = arith.addf %64, %66 : vector<8x8xf32>
    %68 = arith.mulf %67, %10 : vector<8x8xf32>
    %69 = vector.extract_strided_slice %7 {offsets = [14, 0, 0], sizes = [1, 8, 8], strides = [1, 1, 1]} : vector<16x8x8xf32> to vector<1x8x8xf32>
    %70 = vector.shape_cast %69 : vector<1x8x8xf32> to vector<8x8xf32>
    %71 = arith.addf %68, %70 : vector<8x8xf32>
    %72 = arith.mulf %71, %10 : vector<8x8xf32>
    %73 = vector.extract_strided_slice %7 {offsets = [15, 0, 0], sizes = [1, 8, 8], strides = [1, 1, 1]} : vector<16x8x8xf32> to vector<1x8x8xf32>
    %74 = vector.shape_cast %73 : vector<1x8x8xf32> to vector<8x8xf32>
    %75 = arith.addf %72, %74 : vector<8x8xf32>
    %76 = vector.shape_cast %15 : vector<8x8xf32> to vector<1x8x8xf32>
    %77 = vector.shape_cast %19 : vector<8x8xf32> to vector<1x8x8xf32>
    %78 = vector.shape_cast %23 : vector<8x8xf32> to vector<1x8x8xf32>
    %79 = vector.shape_cast %27 : vector<8x8xf32> to vector<1x8x8xf32>
    %80 = vector.shape_cast %31 : vector<8x8xf32> to vector<1x8x8xf32>
    %81 = vector.shape_cast %35 : vector<8x8xf32> to vector<1x8x8xf32>
    %82 = vector.shape_cast %39 : vector<8x8xf32> to vector<1x8x8xf32>
    %83 = vector.shape_cast %43 : vector<8x8xf32> to vector<1x8x8xf32>
    %84 = vector.shape_cast %47 : vector<8x8xf32> to vector<1x8x8xf32>
    %85 = vector.shape_cast %51 : vector<8x8xf32> to vector<1x8x8xf32>
    %86 = vector.shape_cast %55 : vector<8x8xf32> to vector<1x8x8xf32>
    %87 = vector.shape_cast %59 : vector<8x8xf32> to vector<1x8x8xf32>
    %88 = vector.shape_cast %63 : vector<8x8xf32> to vector<1x8x8xf32>
    %89 = vector.shape_cast %67 : vector<8x8xf32> to vector<1x8x8xf32>
    %90 = vector.shape_cast %71 : vector<8x8xf32> to vector<1x8x8xf32>
    %91 = vector.shape_cast %75 : vector<8x8xf32> to vector<1x8x8xf32>
    %92 = tpu.concatenate %76, %77, %78, %79, %80, %81, %82, %83, %84, %85, %86, %87, %88, %89, %90, %91 in 0 : vector<1x8x8xf32>, vector<1x8x8xf32>, vector<1x8x8xf32>, vector<1x8x8xf32>, vector<1x8x8xf32>, vector<1x8x8xf32>, vector<1x8x8xf32>, vector<1x8x8xf32>, vector<1x8x8xf32>, vector<1x8x8xf32>, vector<1x8x8xf32>, vector<1x8x8xf32>, vector<1x8x8xf32>, vector<1x8x8xf32>, vector<1x8x8xf32>, vector<1x8x8xf32> -> vector<16x8x8xf32>
    %c0_9 = arith.constant 0 : index
    %c0_10 = arith.constant 0 : index
    %c0_11 = arith.constant 0 : index
    %93 = vector.load %arg6[%c0_9, %c0_10, %c0_11] : memref<16x8x8xf32, #tpu.memory_space<vmem>>, vector<16x8x8xf32>
    tpu.vector_store %arg6[%c0_9, %c0_10, %c0_11], %92 {strides = array<i32>} : memref<16x8x8xf32, #tpu.memory_space<vmem>>, vector<16x8x8xf32>,
    %c0_12 = arith.constant 0 : index
    %c0_13 = arith.constant 0 : index
    %94 = vector.load %arg7[%c0_12, %c0_13] : memref<8x8xf32, #tpu.memory_space<vmem>>, vector<8x8xf32>
    tpu.vector_store %arg7[%c0_12, %c0_13], %75 {strides = array<i32>} : memref<8x8xf32, #tpu.memory_space<vmem>>, vector<8x8xf32>,
    return
  }
  func.func @transform_0(%arg0: i32, %arg1: i32) -> (i32, i32, i32) {
    %c0_i32 = arith.constant 0 : i32
    %c0_i32_0 = arith.constant 0 : i32
    return %arg1, %arg0, %c0_i32 : i32, i32, i32
  }
  func.func @transform_1(%arg0: i32, %arg1: i32) -> (i32, i32) {
    %c0_i32 = arith.constant 0 : i32
    %c0_i32_0 = arith.constant 0 : i32
    %c0_i32_1 = arith.constant 0 : i32
    return %c0_i32, %c0_i32_0 : i32, i32
  }
  func.func @transform_2(%arg0: i32, %arg1: i32) -> (i32, i32) {
    %c0_i32 = arith.constant 0 : i32
    %c0_i32_0 = arith.constant 0 : i32
    %c0_i32_1 = arith.constant 0 : i32
    return %c0_i32, %c0_i32_0 : i32, i32
  }
  func.func @transform_3(%arg0: i32, %arg1: i32) -> (i32, i32) {
    %c0_i32 = arith.constant 0 : i32
    %c0_i32_0 = arith.constant 0 : i32
    return %arg0, %c0_i32 : i32, i32
  }
  func.func @transform_4(%arg0: i32, %arg1: i32) -> (i32, i32, i32) {
    %c0_i32 = arith.constant 0 : i32
    %c0_i32_0 = arith.constant 0 : i32
    return %arg1, %arg0, %c0_i32 : i32, i32, i32
  }
  func.func @transform_5(%arg0: i32, %arg1: i32) -> (i32, i32) {
    %c0_i32 = arith.constant 0 : i32
    %c0_i32_0 = arith.constant 0 : i32
    return %arg0, %c0_i32 : i32, i32
  }
}

</mosaic_0001>

<bundles_post_ra>
// kernel: non_spiking_mlp_forward_seq.1
= control target key start
LH: loop header
LB: loop body
LE: loop exit
PB: predicated region body
PF: predicated region fallthrough
CT: control target
= control target key end

     0   :  { %vm46_vm0 = vcmask 261120   ;;  %vm24_vm1 = vcmask 64512   ;;  %s588_s1 = inlined_call_operand.vmem [shape: f32[32,8], index: 1, kind: input, shape index: {}]   ;;  %s589_s0 = inlined_call_operand.vmem [shape: f32[16,8,32], index: 0, kind: input, shape index: {}]   ;;  %s590_s3 = inlined_call_operand.vmem [shape: f32[8,8], index: 3, kind: input, shape index: {}, may-alias: {3,5}]   ;;  %s591_s5 = inlined_call_operand.vmem [shape: f32[8,8], index: 5, kind: output, shape index: {1}, may-alias: {3,5}]   ;;  %s592_s2 = inlined_call_operand.vmem [shape: f32[1,8], index: 2, kind: input, shape index: {}]   ;;  %s593_s4 = inlined_call_operand.vmem [shape: f32[16,8,8], index: 4, kind: output, shape index: {0}]  }
   0x1   :  { %v45_v0 = vld [vmem:[%s588_s1 + $0x18] sm:$0xff]  ;;  %v44_v1 = vld [vmem:[%s588_s1 + $0x10] sm:$0xff]  ;;  %v26_v2 = vld [vmem:[%s589_s0] sm:$0xff] }
   0x2   :  { %343 = vmatprep.subr.mxu0 %v45_v0  ;;  %375 = vmatprep.subr.mxu1 %v45_v0  ;;  %v43_v3 = vld [vmem:[%s588_s1 + $0x8] sm:$0xff]  ;;  %v42_v4 = vld [vmem:[%s588_s1] sm:$0xff]  ;;  %v28_v6 = vld [vmem:[%s589_s0 + $0x10] sm:$0xff] }
   0x3   :  { %344 = vmatpush3.msra.mxu0 %v45_v0  ;;  %351 = vmatprep.mubr.msk.f32.mxu0 %vm46_vm0, %v26_v2  ;;  %v27_v5 = vld [vmem:[%s589_s0 + $0x8] sm:$0xff]  ;;  %v34_v7 = vld [vmem:[%s589_s0 + $0x40] sm:$0xff]  ;;  %v36_v9 = vld [vmem:[%s589_s0 + $0x50] sm:$0xff] }
   0x4   :  { %345 = vmatprep.subr.mxu0 %v44_v1  ;;  %379 = vmatpush3.msra.mxu1 %v45_v0  ;;  %v35_v8 = vld [vmem:[%s589_s0 + $0x48] sm:$0xff]  ;;  %v29_v10 = vld [vmem:[%s589_s0 + $0x18] sm:$0xff]  ;;  %v30_v11 = vld [vmem:[%s589_s0 + $0x20] sm:$0xff] }
   0x5   :  { %346 = vmatpush3.msra.mxu0 %v44_v1  ;;  %376 = vmatprep.subr.mxu1 %v44_v1  ;;  %v37_v12 = vld [vmem:[%s589_s0 + $0x58] sm:$0xff]  ;;  %v38_v13 = vld [vmem:[%s589_s0 + $0x60] sm:$0xff]  ;;  %v31_v14 = vld [vmem:[%s589_s0 + $0x28] sm:$0xff] }
   0x6   :  { %347 = vmatprep.subr.mxu0 %v43_v3  ;;  %380 = vmatpush3.msra.mxu1 %v44_v1  ;;  %v32_v15 = vld [vmem:[%s589_s0 + $0x30] sm:$0xff]  ;;  %v39_v16 = vld [vmem:[%s589_s0 + $0x68] sm:$0xff]  ;;  %v33_v18 = vld [vmem:[%s589_s0 + $0x38] sm:$0xff] }
   0x7   :  { %348 = vmatpush3.msra.mxu0 %v43_v3  ;;  %377 = vmatprep.subr.mxu1 %v43_v3  ;;  %v40_v17 = vld [vmem:[%s589_s0 + $0x70] sm:$0xff]  ;;  %v41_v19 = vld [vmem:[%s589_s0 + $0x78] sm:$0xff]  ;;  %v23_v20 = vld [vmem:[%s590_s3] sm:$0xff] }
   0x8   :  { %349 = vmatprep.subr.mxu0 %v42_v4  ;;  %381 = vmatpush3.msra.mxu1 %v43_v3  ;;  %25 = vst.msk [vmem:[%s591_s5] sm:$0xff] %vm24_vm1, %v23_v20  ;;  %v499_v21 = vld [vmem:[%s592_s2] ss:$0 sm:$0xff] }
   0x9   :  { %350 = vmatpush3.msra.mxu0 %v42_v4  ;;  %378 = vmatprep.subr.mxu1 %v42_v4 }
   0xa   :  { %352 = vmatmul.mubr.msk.f32.vlgmr.msra.gmra.mxu0 %vm46_vm0, %v27_v5  ;;  %382 = vmatpush3.msra.mxu1 %v42_v4 }
   0xb   :  { %354 = vmatprep.mubr.msk.f32.mxu0 %vm46_vm0, %v28_v6  ;;  %363 = vmatprep.mubr.msk.f32.mxu1 %vm46_vm0, %v34_v7 }
   0xc   :  { %364 = vmatmul.mubr.msk.f32.vlgmr.msra.gmra.mxu1 %vm46_vm0, %v35_v8 }
   0xd   :  { %366 = vmatprep.mubr.msk.f32.mxu1 %vm46_vm0, %v36_v9 }
   0xe   :  { %355 = vmatmul.mubr.msk.f32.gmra.mxu0 %vm46_vm0, %v29_v10 }
   0xf   :  { %357 = vmatprep.mubr.msk.f32.mxu0 %vm46_vm0, %v30_v11  ;;  %v247_v22 = vld [vmem:[%s591_s5] sm:$0xff] }
  0x10   :  { %367 = vmatmul.mubr.msk.f32.gmra.mxu1 %vm46_vm0, %v37_v12  ;;  %v248_v23 = vmul.f32 %v499_v21, %v247_v22 }
  0x11   :  { %369 = vmatprep.mubr.msk.f32.mxu1 %vm46_vm0, %v38_v13 }
  0x12   :  { %358 = vmatmul.mubr.msk.f32.gmra.mxu0 %vm46_vm0, %v31_v14 }
  0x13   :  { %360 = vmatprep.mubr.msk.f32.mxu0 %vm46_vm0, %v32_v15 }
  0x14   :  { %370 = vmatmul.mubr.msk.f32.gmra.mxu1 %vm46_vm0, %v39_v16 }
  0x15   :  { %372 = vmatprep.mubr.msk.f32.mxu1 %vm46_vm0, %v40_v17 }
  0x16   :  { %361 = vmatmul.mubr.msk.f32.gmra.mxu0 %vm46_vm0, %v33_v18 }
  0x18   :  { %373 = vmatmul.mubr.msk.f32.gmra.mxu1 %vm46_vm0, %v41_v19 }
  0xca   :  { %v353_v24 = vpop.f32.mrf.mxu0 }
  0xcc   :  { %v161_v25 = vpop.f32.mrf.mxu0  ;;  %v365_v46 = vpop.f32.mrf.mxu1 }
  0xcd   :  { %v249_v26 = vadd.f32 %v248_v23, %v161_v25 }
  0xce   :  { %v356_v28 = vpop.f32.mrf.mxu0  ;;  %v201_v49 = vpop.f32.mrf.mxu1 }
  0xcf   :  { %v250_v27 = vmul.f32 %v499_v21, %v249_v26  ;;  %281 = vst.msk [vmem:[%s593_s4] sm:$0xff] %vm24_vm1, %v249_v26 }
  0xd0   :  { %v171_v31 = vpop.f32.mrf.mxu0  ;;  %v368_v52 = vpop.f32.mrf.mxu1 }
  0xd1   :  { %v251_v29 = vadd.f32 %v353_v24, %v250_v27 }
  0xd2   :  { %v359_v34 = vpop.f32.mrf.mxu0  ;;  %v211_v55 = vpop.f32.mrf.mxu1 }
  0xd3   :  { %v252_v30 = vmul.f32 %v499_v21, %v251_v29  ;;  %282 = vst.msk [vmem:[%s593_s4 + $0x8] sm:$0xff] %vm24_vm1, %v251_v29 }
  0xd4   :  { %v181_v37 = vpop.f32.mrf.mxu0  ;;  %v371_v58 = vpop.f32.mrf.mxu1 }
  0xd5   :  { %v253_v32 = vadd.f32 %v252_v30, %v171_v31 }
  0xd6   :  { %v362_v40 = vpop.f32.mrf.mxu0  ;;  %v221_v61 = vpop.f32.mrf.mxu1 }
  0xd7   :  { %v254_v33 = vmul.f32 %v499_v21, %v253_v32  ;;  %283 = vst.msk [vmem:[%s593_s4 + $0x10] sm:$0xff] %vm24_vm1, %v253_v32 }
  0xd8   :  { %v191_v43 = vpop.f32.mrf.mxu0  ;;  %v374_v0 = vpop.f32.mrf.mxu1 }
  0xd9   :  { %v255_v35 = vadd.f32 %v356_v28, %v254_v33 }
  0xda   :  { %v231_v3 = vpop.f32.mrf.mxu1 }
  0xdb   :  { %v256_v36 = vmul.f32 %v499_v21, %v255_v35  ;;  %284 = vst.msk [vmem:[%s593_s4 + $0x18] sm:$0xff] %vm24_vm1, %v255_v35 }
  0xdd   :  { %v257_v38 = vadd.f32 %v256_v36, %v181_v37 }
  0xdf   :  { %v258_v39 = vmul.f32 %v499_v21, %v257_v38  ;;  %285 = vst.msk [vmem:[%s593_s4 + $0x20] sm:$0xff] %vm24_vm1, %v257_v38 }
  0xe1   :  { %v259_v41 = vadd.f32 %v359_v34, %v258_v39 }
  0xe3   :  { %v260_v42 = vmul.f32 %v499_v21, %v259_v41  ;;  %286 = vst.msk [vmem:[%s593_s4 + $0x28] sm:$0xff] %vm24_vm1, %v259_v41 }
  0xe5   :  { %v261_v44 = vadd.f32 %v260_v42, %v191_v43 }
  0xe7   :  { %v262_v45 = vmul.f32 %v499_v21, %v261_v44  ;;  %287 = vst.msk [vmem:[%s593_s4 + $0x30] sm:$0xff] %vm24_vm1, %v261_v44 }
  0xe9   :  { %v263_v47 = vadd.f32 %v362_v40, %v262_v45 }
  0xeb   :  { %v264_v48 = vmul.f32 %v499_v21, %v263_v47  ;;  %288 = vst.msk [vmem:[%s593_s4 + $0x38] sm:$0xff] %vm24_vm1, %v263_v47 }
  0xed   :  { %v265_v50 = vadd.f32 %v264_v48, %v201_v49 }
  0xef   :  { %v266_v51 = vmul.f32 %v499_v21, %v265_v50  ;;  %289 = vst.msk [vmem:[%s593_s4 + $0x40] sm:$0xff] %vm24_vm1, %v265_v50 }
  0xf1   :  { %v267_v53 = vadd.f32 %v365_v46, %v266_v51 }
  0xf3   :  { %v268_v54 = vmul.f32 %v499_v21, %v267_v53  ;;  %290 = vst.msk [vmem:[%s593_s4 + $0x48] sm:$0xff] %vm24_vm1, %v267_v53 }
  0xf5   :  { %v269_v56 = vadd.f32 %v268_v54, %v211_v55 }
  0xf7   :  { %v270_v57 = vmul.f32 %v499_v21, %v269_v56  ;;  %291 = vst.msk [vmem:[%s593_s4 + $0x50] sm:$0xff] %vm24_vm1, %v269_v56 }
  0xf9   :  { %v271_v59 = vadd.f32 %v368_v52, %v270_v57 }
  0xfb   :  { %v272_v60 = vmul.f32 %v499_v21, %v271_v59  ;;  %292 = vst.msk [vmem:[%s593_s4 + $0x58] sm:$0xff] %vm24_vm1, %v271_v59 }
  0xfd   :  { %v273_v62 = vadd.f32 %v272_v60, %v221_v61 }
  0xff   :  { %v274_v63 = vmul.f32 %v499_v21, %v273_v62  ;;  %293 = vst.msk [vmem:[%s593_s4 + $0x60] sm:$0xff] %vm24_vm1, %v273_v62 }
 0x101   :  { %v275_v1 = vadd.f32 %v371_v58, %v274_v63 }
 0x103   :  { %v276_v2 = vmul.f32 %v499_v21, %v275_v1  ;;  %294 = vst.msk [vmem:[%s593_s4 + $0x68] sm:$0xff] %vm24_vm1, %v275_v1 }
 0x105   :  { %v277_v4 = vadd.f32 %v276_v2, %v231_v3 }
 0x107   :  { %v278_v5 = vmul.f32 %v499_v21, %v277_v4  ;;  %295 = vst.msk [vmem:[%s593_s4 + $0x70] sm:$0xff] %vm24_vm1, %v277_v4 }
 0x109   :  { %v279_v6 = vadd.f32 %v374_v0, %v278_v5 }
 0x10b   :  { %296 = vst.msk [vmem:[%s593_s4 + $0x78] sm:$0xff] %vm24_vm1, %v279_v6  ;;  %297 = vst.msk [vmem:[%s591_s5] sm:$0xff] %vm24_vm1, %v279_v6 }

</bundles_post_ra>
